<compile_context>
chip_gen: v7x
topology: tpu7x:2x2x1
jax: 0.10.0
libtpu: 0.0.40
codegen_flags: <defaults>
</compile_context>

<pallas_src>
import math
from functools import partial

import jax
import jax.numpy as jnp
from jax import lax
from jax.experimental import pallas as pl
from jax.experimental.pallas import tpu as pltpu


# --------------------------- kernel ----------------------------------------
def _layer_norm(x, gamma, beta, eps=1e-5):
    # mean / biased variance over the last dim, exactly like LayerNormalisation
    mean = jnp.mean(x, axis=-1, keepdims=True)
    var = jnp.mean(jnp.square(x - mean), axis=-1, keepdims=True)
    return (x - mean) * lax.rsqrt(var + eps) * gamma + beta


def _encoder_layer_kernel(S, H, hd, cdt,
                          x_ref,
                          wqkv_ref, bqkv_ref, hmask_ref,
                          wo_ref, bo_ref,
                          g1_ref, b1n_ref,
                          w1_ref, b1_ref,
                          w2_ref, b2_ref,
                          g2_ref, b2n_ref,
                          out_ref):
    f32 = jnp.float32
    D = H * hd

    x = x_ref[...]                                   # (S, D) f32, one batch element
    xc = x.astype(cdt)                               # single hoisted activation cast
    hmask = hmask_ref[...]                           # (H*S, D) {0,1} in cdt (constant)

    # ---- fused QKV projection (weights already in cdt) ----------------------
    qkv = jnp.dot(xc, wqkv_ref[...], preferred_element_type=f32) + bqkv_ref[...]
    q = qkv[:, :D]                                   # columns are (head, head_dim) ordered
    k = qkv[:, D:2 * D]
    v = qkv[:, 2 * D:]

    # ---- stacked-head attention: all heads of this batch in 3 matmuls -------
    # k_st row r = (head h = r // S, key pos sk = r % S), zeroed outside head h's cols.
    k_st = (jnp.tile(k, (H, 1)) * hmask).astype(cdt)     # (H*S, D)
    v_st = (jnp.tile(v, (H, 1)) * hmask).astype(cdt)     # (H*S, D)

    # scores[sq, (h, sk)] = q_h(sq) . k_h(sk)
    s = lax.dot_general(q.astype(cdt), k_st,
                        (((1,), (1,)), ((), ())),
                        preferred_element_type=f32)      # (S, H*S)
    s = s * (1.0 / math.sqrt(hd))

    # global row max is softmax-shift-invariant per head segment; clamp denom to
    # guard the rare per-head underflow case.
    p = jnp.exp(s - jnp.max(s, axis=-1, keepdims=True))  # (S, H*S)
    pc = p.astype(cdt)
    denom = jnp.dot(pc, hmask, preferred_element_type=f32)   # (S, D) per-head sums, bcast over hd
    num = jnp.dot(pc, v_st, preferred_element_type=f32)      # (S, D) unnormalised output
    denom = jnp.maximum(denom, 1e-30)
    values = num * pl.reciprocal(denom, approx=True)          # == concat_h softmax(s_h) @ v_h

    attn_out = jnp.dot(values.astype(cdt), wo_ref[...],
                       preferred_element_type=f32) + bo_ref[...]

    # ---- Add & LayerNorm 1 / FFN / Add & LayerNorm 2 -------------------------
    x1 = _layer_norm(attn_out + x, g1_ref[...], b1n_ref[...])
    h1 = jnp.maximum(jnp.dot(x1.astype(cdt), w1_ref[...],
                             preferred_element_type=f32) + b1_ref[...], 0.0)
    ffn = jnp.dot(h1.astype(cdt), w2_ref[...],
                  preferred_element_type=f32) + b2_ref[...]
    x2 = _layer_norm(ffn + x1, g2_ref[...], b2n_ref[...])

    out_ref[...] = x2.astype(out_ref.dtype)


# --------------------------- wrapper ----------------------------------------
def encoder_layer_pallas(x, params, num_heads, matmul_dtype=jnp.bfloat16):
    """x: (B, S, D) float32. params: one layer's weights (torch-style fused qkv)."""
    B, S, D = x.shape
    H = num_heads
    hd = D // H
    assert H * hd == D
    cdt = matmul_dtype

    # De-interleave the fused torch qkv weight ONCE: torch orders the 3*D output
    # columns as (head, {q,k,v}, head_dim); the kernel wants [ q | k | v ] with
    # (head, head_dim)-ordered columns inside each block.  Cast matmul weights
    # to the MXU dtype here (biases / LN params stay f32).
    wqkv4 = params["wqkv"].reshape(D, H, 3, hd)
    bqkv4 = params["bqkv"].reshape(1, H, 3, hd)
    wqkv = jnp.concatenate(
        [wqkv4[:, :, i, :].reshape(D, D) for i in range(3)], axis=1).astype(cdt)  # (D, 3D)
    bqkv = jnp.concatenate(
        [bqkv4[:, :, i, :].reshape(1, D) for i in range(3)], axis=1)              # (1, 3D) f32

    # Shape-only head mask: hmask[(h, sk), c] = 1 iff column c belongs to head h.
    R = H * S
    hmask = ((jnp.arange(R)[:, None] // S) ==
             (jnp.arange(D)[None, :] // hd)).astype(cdt)                          # (H*S, D)

    wo = params["wo"].astype(cdt)
    w1 = params["w1"].astype(cdt)
    w2 = params["w2"].astype(cdt)

    args = (x.reshape(B * S, D),
            wqkv, bqkv, hmask,
            wo, params["bo"],
            params["gamma1"], params["beta1"],
            w1, params["b1"],
            w2, params["b2"],
            params["gamma2"], params["beta2"])

    # Grid over batch: each step handles one batch element (attention never
    # crosses batches), marked "parallel" so v7x shards it over its 2 TCs.
    row_spec = pl.BlockSpec((S, D), lambda b: (b, 0))

    def full(a):  # whole-array block, resident across grid steps
        return pl.BlockSpec(a.shape, lambda b: (0, 0))

    in_specs = [row_spec] + [full(a) for a in args[1:]]

    kernel = partial(_encoder_layer_kernel, S, H, hd, cdt)

    out = pl.pallas_call(
        kernel,
        grid=(B,),
        out_shape=jax.ShapeDtypeStruct((B * S, D), x.dtype),
        in_specs=in_specs,
        out_specs=row_spec,
        compiler_params=pltpu.CompilerParams(
            dimension_semantics=("parallel",),
            vmem_limit_bytes=32 * 1024 * 1024),
    )(*args)
    return out.reshape(B, S, D)


# ------------------------- pure-JAX reference --------------------------------
def _layer_norm_ref(x, gamma, beta, eps=1e-5):
    mean = jnp.mean(x, axis=-1, keepdims=True)
    var = jnp.mean((x - mean) ** 2, axis=-1, keepdims=True)
    return gamma * ((x - mean) / jnp.sqrt(var + eps)) + beta


def encoder_layer_reference(x, p, num_heads):
    B, S, D = x.shape
    hd = D // num_heads
    qkv = x @ p["wqkv"] + p["bqkv"][0]                          # (B,S,3D)
    qkv = qkv.reshape(B, S, num_heads, 3 * hd).transpose(0, 2, 1, 3)
    q, k, v = jnp.split(qkv, 3, axis=-1)                        # (B,H,S,hd)
    s = jnp.einsum("bhsd,bhtd->bhst", q, k) / math.sqrt(hd)
    a = jax.nn.softmax(s, axis=-1)
    vals = jnp.einsum("bhst,bhtd->bhsd", a, v)
    vals = vals.transpose(0, 2, 1, 3).reshape(B, S, D)
    attn_out = vals @ p["wo"] + p["bo"][0]
    x1 = _layer_norm_ref(attn_out + x, p["gamma1"][0], p["beta1"][0])
    h1 = jnp.maximum(x1 @ p["w1"] + p["b1"][0], 0.0)
    ffn = h1 @ p["w2"] + p["b2"][0]
    return _layer_norm_ref(ffn + x1, p["gamma2"][0], p["beta2"][0])


def init_layer_params(key, d_model, ffn_hidden):
    ks = jax.random.split(key, 6)
    sc = lambda fan_in: 1.0 / math.sqrt(fan_in)
    return {
        "wqkv": jax.random.normal(ks[0], (d_model, 3 * d_model), jnp.float32) * sc(d_model),
        "bqkv": jax.random.normal(ks[1], (1, 3 * d_model), jnp.float32) * 0.01,
        "wo":   jax.random.normal(ks[2], (d_model, d_model), jnp.float32) * sc(d_model),
        "bo":   jax.random.normal(ks[3], (1, d_model), jnp.float32) * 0.01,
        "gamma1": jnp.ones((1, d_model), jnp.float32),
        "beta1":  jnp.zeros((1, d_model), jnp.float32),
        "w1":   jax.random.normal(ks[4], (d_model, ffn_hidden), jnp.float32) * sc(d_model),
        "b1":   jnp.zeros((1, ffn_hidden), jnp.float32),
        "w2":   jax.random.normal(ks[5], (ffn_hidden, d_model), jnp.float32) * sc(ffn_hidden),
        "b2":   jnp.zeros((1, d_model), jnp.float32),
        "gamma2": jnp.ones((1, d_model), jnp.float32),
        "beta2":  jnp.zeros((1, d_model), jnp.float32),
    }


if __name__ == "__main__":
    # Small shapes implied by the module: batch=2, seq=8, d_model=32,
    # num_heads=8 (head_dim=4), ffn_hidden=64.
    batch, seq, d_model = 2, 8, 32
    num_heads, ffn_hidden = 8, 64

    key = jax.random.PRNGKey(0)
    kx, kp = jax.random.split(key)
    x = jax.random.normal(kx, (batch, seq, d_model), jnp.float32)
    params = init_layer_params(kp, d_model, ffn_hidden)

    ref = encoder_layer_reference(x, params, num_heads)

    # (1) semantic check: f32 MXU operands (tight tolerance; approx reciprocal /
    #     rsqrt contribute only ~1e-4-level differences).
    out_f32 = jax.block_until_ready(
        encoder_layer_pallas(x, params, num_heads, matmul_dtype=jnp.float32))
    assert out_f32.shape == (batch, seq, d_model)
    assert jnp.allclose(out_f32, ref, atol=5e-3, rtol=5e-3), "f32 kernel mismatch vs reference"

    # (2) performance path: bf16 weights + bf16 MXU operands (v6e/v7x native),
    #     f32 accumulation and f32 elementwise math; looser tolerance reflects
    #     bf16 operand rounding only (a structural bug would be O(1) off).
    out_bf16 = jax.block_until_ready(
        encoder_layer_pallas(x, params, num_heads, matmul_dtype=jnp.bfloat16))
    assert out_bf16.shape == (batch, seq, d_model)
    assert jnp.allclose(out_bf16, ref, atol=6e-2, rtol=6e-2), "bf16 kernel mismatch vs reference"

    print("KERNEL_OK")
</pallas_src>

<mosaic_0001>
module attributes {stable_mosaic.version = 11 : i64} {
  func.func @_encoder_layer_kernel(%arg0: i32, %arg1: memref<8x32xf32, #tpu.memory_space<vmem>>, %arg2: memref<32x96xf32, #tpu.memory_space<vmem>>, %arg3: memref<1x96xf32, #tpu.memory_space<vmem>>, %arg4: memref<64x32xf32, #tpu.memory_space<vmem>>, %arg5: memref<32x32xf32, #tpu.memory_space<vmem>>, %arg6: memref<1x32xf32, #tpu.memory_space<vmem>>, %arg7: memref<1x32xf32, #tpu.memory_space<vmem>>, %arg8: memref<1x32xf32, #tpu.memory_space<vmem>>, %arg9: memref<32x64xf32, #tpu.memory_space<vmem>>, %arg10: memref<1x64xf32, #tpu.memory_space<vmem>>, %arg11: memref<64x32xf32, #tpu.memory_space<vmem>>, %arg12: memref<1x32xf32, #tpu.memory_space<vmem>>, %arg13: memref<1x32xf32, #tpu.memory_space<vmem>>, %arg14: memref<1x32xf32, #tpu.memory_space<vmem>>, %arg15: memref<8x32xf32, #tpu.memory_space<vmem>>) attributes {dimension_semantics = [#tpu.dimension_semantics<parallel>], iteration_bounds = array<i64: 2>, scalar_prefetch = 0 : i64, scratch_operands = 0 : i64, tpu.core_type = #tpu.core_type<tc>, window_params = [{transform_indices = @transform_0, window_bounds = array<i64: 8, 32>}, {pipeline_mode = #tpu.pipeline_mode<synchronous>, transform_indices = @transform_1, window_bounds = array<i64: 32, 96>}, {pipeline_mode = #tpu.pipeline_mode<synchronous>, transform_indices = @transform_2, window_bounds = array<i64: 1, 96>}, {pipeline_mode = #tpu.pipeline_mode<synchronous>, transform_indices = @transform_3, window_bounds = array<i64: 64, 32>}, {pipeline_mode = #tpu.pipeline_mode<synchronous>, transform_indices = @transform_4, window_bounds = array<i64: 32, 32>}, {pipeline_mode = #tpu.pipeline_mode<synchronous>, transform_indices = @transform_5, window_bounds = array<i64: 1, 32>}, {pipeline_mode = #tpu.pipeline_mode<synchronous>, transform_indices = @transform_6, window_bounds = array<i64: 1, 32>}, {pipeline_mode = #tpu.pipeline_mode<synchronous>, transform_indices = @transform_7, window_bounds = array<i64: 1, 32>}, {pipeline_mode = #tpu.pipeline_mode<synchronous>, transform_indices = @transform_8, window_bounds = array<i64: 32, 64>}, {pipeline_mode = #tpu.pipeline_mode<synchronous>, transform_indices = @transform_9, window_bounds = array<i64: 1, 64>}, {pipeline_mode = #tpu.pipeline_mode<synchronous>, transform_indices = @transform_10, window_bounds = array<i64: 64, 32>}, {pipeline_mode = #tpu.pipeline_mode<synchronous>, transform_indices = @transform_11, window_bounds = array<i64: 1, 32>}, {pipeline_mode = #tpu.pipeline_mode<synchronous>, transform_indices = @transform_12, window_bounds = array<i64: 1, 32>}, {pipeline_mode = #tpu.pipeline_mode<synchronous>, transform_indices = @transform_13, window_bounds = array<i64: 1, 32>}, {transform_indices = @transform_14, window_bounds = array<i64: 8, 32>}]} {
    %c0 = arith.constant 0 : index
    %c0_0 = arith.constant 0 : index
    %0 = vector.load %arg1[%c0, %c0_0] : memref<8x32xf32, #tpu.memory_space<vmem>>, vector<8x32xf32>
    %c0_1 = arith.constant 0 : index
    %c0_2 = arith.constant 0 : index
    %1 = vector.load %arg4[%c0_1, %c0_2] : memref<64x32xf32, #tpu.memory_space<vmem>>, vector<64x32xf32>
    %c0_3 = arith.constant 0 : index
    %c0_4 = arith.constant 0 : index
    %2 = vector.load %arg2[%c0_3, %c0_4] : memref<32x96xf32, #tpu.memory_space<vmem>>, vector<32x96xf32>
    %cst = arith.constant dense<0.000000e+00> : vector<8x96xf32>
    %3 = tpu.matmul %0, %2, %cst {dimension_numbers = #tpu.dot_dimension_numbers<[1], [0], [0], [1], [0, 0, 1, 1], [], []>} : vector<8x32xf32>, vector<32x96xf32>, vector<8x96xf32> -> vector<8x96xf32>
    %c0_5 = arith.constant 0 : index
    %c0_6 = arith.constant 0 : index
    %4 = vector.load %arg3[%c0_5, %c0_6] : memref<1x96xf32, #tpu.memory_space<vmem>>, vector<1x96xf32>
    %5 = vector.broadcast %4 : vector<1x96xf32> to vector<8x96xf32>
    %6 = arith.addf %3, %5 : vector<8x96xf32>
    %7 = vector.extract_strided_slice %6 {offsets = [0, 0], sizes = [8, 32], strides = [1, 1]} : vector<8x96xf32> to vector<8x32xf32>
    %8 = vector.extract_strided_slice %6 {offsets = [0, 32], sizes = [8, 32], strides = [1, 1]} : vector<8x96xf32> to vector<8x32xf32>
    %9 = vector.extract_strided_slice %6 {offsets = [0, 64], sizes = [8, 32], strides = [1, 1]} : vector<8x96xf32> to vector<8x32xf32>
    %10 = tpu.concatenate %8, %8, %8, %8, %8, %8, %8, %8 in 0 : vector<8x32xf32>, vector<8x32xf32>, vector<8x32xf32>, vector<8x32xf32>, vector<8x32xf32>, vector<8x32xf32>, vector<8x32xf32>, vector<8x32xf32> -> vector<64x32xf32>
    %11 = arith.mulf %10, %1 : vector<64x32xf32>
    %12 = tpu.concatenate %9, %9, %9, %9, %9, %9, %9, %9 in 0 : vector<8x32xf32>, vector<8x32xf32>, vector<8x32xf32>, vector<8x32xf32>, vector<8x32xf32>, vector<8x32xf32>, vector<8x32xf32>, vector<8x32xf32> -> vector<64x32xf32>
    %13 = arith.mulf %12, %1 : vector<64x32xf32>
    %cst_7 = arith.constant dense<0.000000e+00> : vector<8x64xf32>
    %14 = tpu.matmul %7, %11, %cst_7 {dimension_numbers = #tpu.dot_dimension_numbers<[1], [1], [0], [0], [0, 0, 1, 0], [], []>} : vector<8x32xf32>, vector<64x32xf32>, vector<8x64xf32> -> vector<8x64xf32>
    %cst_8 = arith.constant 5.000000e-01 : f32
    %15 = vector.broadcast %cst_8 : f32 to vector<8x64xf32>
    %16 = arith.mulf %14, %15 : vector<8x64xf32>
    %cst_9 = arith.constant dense<0xFF800000> : vector<8xf32>
    %17 = vector.multi_reduction <maximumf>, %16, %cst_9 [1] : vector<8x64xf32> to vector<8xf32>
    %18 = vector.shape_cast %17 : vector<8xf32> to vector<8x1xf32>
    %19 = vector.broadcast %18 : vector<8x1xf32> to vector<8x64xf32>
    %20 = arith.subf %16, %19 : vector<8x64xf32>
    %21 = math.exp %20 : vector<8x64xf32>
    %cst_10 = arith.constant dense<0.000000e+00> : vector<8x32xf32>
    %22 = tpu.matmul %21, %1, %cst_10 {dimension_numbers = #tpu.dot_dimension_numbers<[1], [0], [0], [1], [0, 0, 1, 1], [], []>} : vector<8x64xf32>, vector<64x32xf32>, vector<8x32xf32> -> vector<8x32xf32>
    %cst_11 = arith.constant dense<0.000000e+00> : vector<8x32xf32>
    %23 = tpu.matmul %21, %13, %cst_11 {dimension_numbers = #tpu.dot_dimension_numbers<[1], [0], [0], [1], [0, 0, 1, 1], [], []>} : vector<8x64xf32>, vector<64x32xf32>, vector<8x32xf32> -> vector<8x32xf32>
    %cst_12 = arith.constant 1.000000e-30 : f32
    %24 = vector.broadcast %cst_12 : f32 to vector<8x32xf32>
    %25 = arith.maximumf %22, %24 : vector<8x32xf32>
    %26 = tpu.reciprocal %25 {approx = true} : vector<8x32xf32> -> vector<8x32xf32>
    %27 = arith.mulf %23, %26 : vector<8x32xf32>
    %c0_13 = arith.constant 0 : index
    %c0_14 = arith.constant 0 : index
    %28 = vector.load %arg5[%c0_13, %c0_14] : memref<32x32xf32, #tpu.memory_space<vmem>>, vector<32x32xf32>
    %cst_15 = arith.constant dense<0.000000e+00> : vector<8x32xf32>
    %29 = tpu.matmul %27, %28, %cst_15 {dimension_numbers = #tpu.dot_dimension_numbers<[1], [0], [0], [1], [0, 0, 1, 1], [], []>} : vector<8x32xf32>, vector<32x32xf32>, vector<8x32xf32> -> vector<8x32xf32>
    %c0_16 = arith.constant 0 : index
    %c0_17 = arith.constant 0 : index
    %30 = vector.load %arg6[%c0_16, %c0_17] : memref<1x32xf32, #tpu.memory_space<vmem>>, vector<1x32xf32>
    %31 = vector.broadcast %30 : vector<1x32xf32> to vector<8x32xf32>
    %32 = arith.addf %29, %31 : vector<8x32xf32>
    %33 = arith.addf %32, %0 : vector<8x32xf32>
    %c0_18 = arith.constant 0 : index
    %c0_19 = arith.constant 0 : index
    %34 = vector.load %arg7[%c0_18, %c0_19] : memref<1x32xf32, #tpu.memory_space<vmem>>, vector<1x32xf32>
    %c0_20 = arith.constant 0 : index
    %c0_21 = arith.constant 0 : index
    %35 = vector.load %arg8[%c0_20, %c0_21] : memref<1x32xf32, #tpu.memory_space<vmem>>, vector<1x32xf32>
    %cst_22 = arith.constant dense<0.000000e+00> : vector<8xf32>
    %36 = vector.multi_reduction <add>, %33, %cst_22 [1] : vector<8x32xf32> to vector<8xf32>
    %37 = vector.shape_cast %36 : vector<8xf32> to vector<8x1xf32>
    %cst_23 = arith.constant 3.200000e+01 : f32
    %38 = vector.broadcast %cst_23 : f32 to vector<8x1xf32>
    %39 = arith.divf %37, %38 : vector<8x1xf32>
    %40 = vector.broadcast %39 : vector<8x1xf32> to vector<8x32xf32>
    %41 = arith.subf %33, %40 : vector<8x32xf32>
    %42 = arith.mulf %41, %41 : vector<8x32xf32>
    %cst_24 = arith.constant dense<0.000000e+00> : vector<8xf32>
    %43 = vector.multi_reduction <add>, %42, %cst_24 [1] : vector<8x32xf32> to vector<8xf32>
    %44 = vector.shape_cast %43 : vector<8xf32> to vector<8x1xf32>
    %cst_25 = arith.constant 3.200000e+01 : f32
    %45 = vector.broadcast %cst_25 : f32 to vector<8x1xf32>
    %46 = arith.divf %44, %45 : vector<8x1xf32>
    %47 = vector.broadcast %39 : vector<8x1xf32> to vector<8x32xf32>
    %48 = arith.subf %33, %47 : vector<8x32xf32>
    %cst_26 = arith.constant 9.99999974E-6 : f32
    %49 = vector.broadcast %cst_26 : f32 to vector<8x1xf32>
    %50 = arith.addf %46, %49 : vector<8x1xf32>
    %51 = math.rsqrt %50 : vector<8x1xf32>
    %52 = vector.broadcast %51 : vector<8x1xf32> to vector<8x32xf32>
    %53 = arith.mulf %48, %52 : vector<8x32xf32>
    %54 = vector.broadcast %34 : vector<1x32xf32> to vector<8x32xf32>
    %55 = arith.mulf %53, %54 : vector<8x32xf32>
    %56 = vector.broadcast %35 : vector<1x32xf32> to vector<8x32xf32>
    %57 = arith.addf %55, %56 : vector<8x32xf32>
    %c0_27 = arith.constant 0 : index
    %c0_28 = arith.constant 0 : index
    %58 = vector.load %arg9[%c0_27, %c0_28] : memref<32x64xf32, #tpu.memory_space<vmem>>, vector<32x64xf32>
    %cst_29 = arith.constant dense<0.000000e+00> : vector<8x64xf32>
    %59 = tpu.matmul %57, %58, %cst_29 {dimension_numbers = #tpu.dot_dimension_numbers<[1], [0], [0], [1], [0, 0, 1, 1], [], []>} : vector<8x32xf32>, vector<32x64xf32>, vector<8x64xf32> -> vector<8x64xf32>
    %c0_30 = arith.constant 0 : index
    %c0_31 = arith.constant 0 : index
    %60 = vector.load %arg10[%c0_30, %c0_31] : memref<1x64xf32, #tpu.memory_space<vmem>>, vector<1x64xf32>
    %61 = vector.broadcast %60 : vector<1x64xf32> to vector<8x64xf32>
    %62 = arith.addf %59, %61 : vector<8x64xf32>
    %cst_32 = arith.constant 0.000000e+00 : f32
    %63 = vector.broadcast %cst_32 : f32 to vector<8x64xf32>
    %64 = arith.maximumf %62, %63 : vector<8x64xf32>
    %c0_33 = arith.constant 0 : index
    %c0_34 = arith.constant 0 : index
    %65 = vector.load %arg11[%c0_33, %c0_34] : memref<64x32xf32, #tpu.memory_space<vmem>>, vector<64x32xf32>
    %cst_35 = arith.constant dense<0.000000e+00> : vector<8x32xf32>
    %66 = tpu.matmul %64, %65, %cst_35 {dimension_numbers = #tpu.dot_dimension_numbers<[1], [0], [0], [1], [0, 0, 1, 1], [], []>} : vector<8x64xf32>, vector<64x32xf32>, vector<8x32xf32> -> vector<8x32xf32>
    %c0_36 = arith.constant 0 : index
    %c0_37 = arith.constant 0 : index
    %67 = vector.load %arg12[%c0_36, %c0_37] : memref<1x32xf32, #tpu.memory_space<vmem>>, vector<1x32xf32>
    %68 = vector.broadcast %67 : vector<1x32xf32> to vector<8x32xf32>
    %69 = arith.addf %66, %68 : vector<8x32xf32>
    %70 = arith.addf %69, %57 : vector<8x32xf32>
    %c0_38 = arith.constant 0 : index
    %c0_39 = arith.constant 0 : index
    %71 = vector.load %arg13[%c0_38, %c0_39] : memref<1x32xf32, #tpu.memory_space<vmem>>, vector<1x32xf32>
    %c0_40 = arith.constant 0 : index
    %c0_41 = arith.constant 0 : index
    %72 = vector.load %arg14[%c0_40, %c0_41] : memref<1x32xf32, #tpu.memory_space<vmem>>, vector<1x32xf32>
    %cst_42 = arith.constant dense<0.000000e+00> : vector<8xf32>
    %73 = vector.multi_reduction <add>, %70, %cst_42 [1] : vector<8x32xf32> to vector<8xf32>
    %74 = vector.shape_cast %73 : vector<8xf32> to vector<8x1xf32>
    %cst_43 = arith.constant 3.200000e+01 : f32
    %75 = vector.broadcast %cst_43 : f32 to vector<8x1xf32>
    %76 = arith.divf %74, %75 : vector<8x1xf32>
    %77 = vector.broadcast %76 : vector<8x1xf32> to vector<8x32xf32>
    %78 = arith.subf %70, %77 : vector<8x32xf32>
    %79 = arith.mulf %78, %78 : vector<8x32xf32>
    %cst_44 = arith.constant dense<0.000000e+00> : vector<8xf32>
    %80 = vector.multi_reduction <add>, %79, %cst_44 [1] : vector<8x32xf32> to vector<8xf32>
    %81 = vector.shape_cast %80 : vector<8xf32> to vector<8x1xf32>
    %cst_45 = arith.constant 3.200000e+01 : f32
    %82 = vector.broadcast %cst_45 : f32 to vector<8x1xf32>
    %83 = arith.divf %81, %82 : vector<8x1xf32>
    %84 = vector.broadcast %76 : vector<8x1xf32> to vector<8x32xf32>
    %85 = arith.subf %70, %84 : vector<8x32xf32>
    %cst_46 = arith.constant 9.99999974E-6 : f32
    %86 = vector.broadcast %cst_46 : f32 to vector<8x1xf32>
    %87 = arith.addf %83, %86 : vector<8x1xf32>
    %88 = math.rsqrt %87 : vector<8x1xf32>
    %89 = vector.broadcast %88 : vector<8x1xf32> to vector<8x32xf32>
    %90 = arith.mulf %85, %89 : vector<8x32xf32>
    %91 = vector.broadcast %71 : vector<1x32xf32> to vector<8x32xf32>
    %92 = arith.mulf %90, %91 : vector<8x32xf32>
    %93 = vector.broadcast %72 : vector<1x32xf32> to vector<8x32xf32>
    %94 = arith.addf %92, %93 : vector<8x32xf32>
    %c0_47 = arith.constant 0 : index
    %c0_48 = arith.constant 0 : index
    %95 = vector.load %arg15[%c0_47, %c0_48] : memref<8x32xf32, #tpu.memory_space<vmem>>, vector<8x32xf32>
    tpu.vector_store %arg15[%c0_47, %c0_48], %94 {strides = array<i32>} : memref<8x32xf32, #tpu.memory_space<vmem>>, vector<8x32xf32>,
    return
  }
  func.func @transform_0(%arg0: i32) -> (i32, i32) {
    %c0_i32 = arith.constant 0 : i32
    %c0_i32_0 = arith.constant 0 : i32
    return %arg0, %c0_i32 : i32, i32
  }
  func.func @transform_1(%arg0: i32) -> (i32, i32) {
    %c0_i32 = arith.constant 0 : i32
    %c0_i32_0 = arith.constant 0 : i32
    %c0_i32_1 = arith.constant 0 : i32
    return %c0_i32, %c0_i32_0 : i32, i32
  }
  func.func @transform_2(%arg0: i32) -> (i32, i32) {
    %c0_i32 = arith.constant 0 : i32
    %c0_i32_0 = arith.constant 0 : i32
    %c0_i32_1 = arith.constant 0 : i32
    return %c0_i32, %c0_i32_0 : i32, i32
  }
  func.func @transform_3(%arg0: i32) -> (i32, i32) {
    %c0_i32 = arith.constant 0 : i32
    %c0_i32_0 = arith.constant 0 : i32
    %c0_i32_1 = arith.constant 0 : i32
    return %c0_i32, %c0_i32_0 : i32, i32
  }
  func.func @transform_4(%arg0: i32) -> (i32, i32) {
    %c0_i32 = arith.constant 0 : i32
    %c0_i32_0 = arith.constant 0 : i32
    %c0_i32_1 = arith.constant 0 : i32
    return %c0_i32, %c0_i32_0 : i32, i32
  }
  func.func @transform_5(%arg0: i32) -> (i32, i32) {
    %c0_i32 = arith.constant 0 : i32
    %c0_i32_0 = arith.constant 0 : i32
    %c0_i32_1 = arith.constant 0 : i32
    return %c0_i32, %c0_i32_0 : i32, i32
  }
  func.func @transform_6(%arg0: i32) -> (i32, i32) {
    %c0_i32 = arith.constant 0 : i32
    %c0_i32_0 = arith.constant 0 : i32
    %c0_i32_1 = arith.constant 0 : i32
    return %c0_i32, %c0_i32_0 : i32, i32
  }
  func.func @transform_7(%arg0: i32) -> (i32, i32) {
    %c0_i32 = arith.constant 0 : i32
    %c0_i32_0 = arith.constant 0 : i32
    %c0_i32_1 = arith.constant 0 : i32
    return %c0_i32, %c0_i32_0 : i32, i32
  }
  func.func @transform_8(%arg0: i32) -> (i32, i32) {
    %c0_i32 = arith.constant 0 : i32
    %c0_i32_0 = arith.constant 0 : i32
    %c0_i32_1 = arith.constant 0 : i32
    return %c0_i32, %c0_i32_0 : i32, i32
  }
  func.func @transform_9(%arg0: i32) -> (i32, i32) {
    %c0_i32 = arith.constant 0 : i32
    %c0_i32_0 = arith.constant 0 : i32
    %c0_i32_1 = arith.constant 0 : i32
    return %c0_i32, %c0_i32_0 : i32, i32
  }
  func.func @transform_10(%arg0: i32) -> (i32, i32) {
    %c0_i32 = arith.constant 0 : i32
    %c0_i32_0 = arith.constant 0 : i32
    %c0_i32_1 = arith.constant 0 : i32
    return %c0_i32, %c0_i32_0 : i32, i32
  }
  func.func @transform_11(%arg0: i32) -> (i32, i32) {
    %c0_i32 = arith.constant 0 : i32
    %c0_i32_0 = arith.constant 0 : i32
    %c0_i32_1 = arith.constant 0 : i32
    return %c0_i32, %c0_i32_0 : i32, i32
  }
  func.func @transform_12(%arg0: i32) -> (i32, i32) {
    %c0_i32 = arith.constant 0 : i32
    %c0_i32_0 = arith.constant 0 : i32
    %c0_i32_1 = arith.constant 0 : i32
    return %c0_i32, %c0_i32_0 : i32, i32
  }
  func.func @transform_13(%arg0: i32) -> (i32, i32) {
    %c0_i32 = arith.constant 0 : i32
    %c0_i32_0 = arith.constant 0 : i32
    %c0_i32_1 = arith.constant 0 : i32
    return %c0_i32, %c0_i32_0 : i32, i32
  }
  func.func @transform_14(%arg0: i32) -> (i32, i32) {
    %c0_i32 = arith.constant 0 : i32
    %c0_i32_0 = arith.constant 0 : i32
    return %arg0, %c0_i32 : i32, i32
  }
}

</mosaic_0001>

<bundles_post_ra>
// kernel: tpu_custom_call.1
= control target key start
LH: loop header
LB: loop body
LE: loop exit
PB: predicated region body
PF: predicated region fallthrough
CT: control target
= control target key end

     0   :  { %s2156_s0 = inlined_call_operand.vmem [shape: f32[16,32], index: 0, kind: input, shape index: {}]   ;;  %s2157_s1 = inlined_call_operand.vmem [shape: f32[32,96], index: 1, kind: input, shape index: {}]   ;;  %s2158_s2 = inlined_call_operand.vmem [shape: f32[1,96], index: 2, kind: input, shape index: {}]   ;;  %s2159_s3 = inlined_call_operand.vmem [shape: f32[64,32], index: 3, kind: input, shape index: {}]   ;;  %s2160_s4 = inlined_call_operand.vmem [shape: f32[32,32], index: 4, kind: input, shape index: {}]   ;;  %s2161_s5 = inlined_call_operand.vmem [shape: f32[1,32], index: 5, kind: input, shape index: {}]   ;;  %s2162_s6 = inlined_call_operand.vmem [shape: f32[1,32], index: 6, kind: input, shape index: {}]   ;;  %s2163_s7 = inlined_call_operand.vmem [shape: f32[1,32], index: 7, kind: input, shape index: {}]   ;;  %s2164_s8 = inlined_call_operand.vmem [shape: f32[32,64], index: 8, kind: input, shape index: {}]   ;;  %s2165_s9 = inlined_call_operand.vmem [shape: f32[1,64], index: 9, kind: input, shape index: {}]   ;;  %s2166_s10 = inlined_call_operand.vmem [shape: f32[64,32], index: 10, kind: input, shape index: {}]   ;;  %s2167_s11 = inlined_call_operand.vmem [shape: f32[1,32], index: 11, kind: input, shape index: {}]   ;;  %s2168_s12 = inlined_call_operand.vmem [shape: f32[1,32], index: 12, kind: input, shape index: {}]   ;;  %s2169_s13 = inlined_call_operand.vmem [shape: f32[1,32], index: 13, kind: input, shape index: {}]   ;;  %s2170_s14 = inlined_call_operand.hbm [shape: f32[16,32], index: 14, kind: output, shape index: {}]  }
   0x1   :  { %2173 = sst [smem:[#allocation6_spill]] %s2156_s0 }
   0x2   :  { %2174 = sst [smem:[#allocation7_spill]] %s2157_s1 }
   0x3   :  { %2175 = sst [smem:[#allocation8_spill]] %s2158_s2 }
   0x4   :  { %2176 = sst [smem:[#allocation9_spill]] %s2159_s3 }
   0x5   :  { %19 = vsyncpa [#allocation3], 0 }
   0x6   :  { %21 = vsyncpa [#allocation3 + $0x1], 0  ;;  %s1822_s29 = smov 0   ;;  %s1824_s30 = smov 0  }
   0x7   :  { %s1826_s15 = smov 0   ;;  %s1828_s16 = smov 0  }
   0x8 LB: > { %s1843_s17 = sadd.s32 4294967295, %s1738_s16   ;;  %s1320_s18 = sadd.s32 4294967294, %s1738_s16   ;;  %s1738_s16 = sphi %s1828_s16, %s2191_s16   ;;  %s1734_s15 = sphi %s1826_s15, %s2190_s15   ;;  %s1730_s30 = sphi %s1824_s30, %s2189_s30   ;;  %s1726_s29 = sphi %s1822_s29, %s2188_s29  }
   0x9   : > { %s1847_s19 = sadd.s32 1, %s1738_s16   ;;  %s333_s20 = sadd.s32 1, %s1734_s15 }
   0xa   : > { %s330_s21 = ssub.s32 %s1738_s16, %s1847_s19  ;;  %p343_p0 = scmp.ne.s32.totalorder %s1734_s15, %s1730_s30 }
   0xb   : > { %p331_p1 = scmp.eq.s32.totalorder %s330_s21, 0  ;;  %p344_p2 = scmp.eq.s32.totalorder %s1843_s17, 1 }
   0xc   : > { %p349_p3 = scmp.ne.s32.totalorder %s1730_s30, %s1726_s29  ;;  %p350_p4 = scmp.eq.s32.totalorder %s1320_s18, 1 }
   0xd   : > { %s1858_s22 = scalar_select %p331_p1, %s1734_s15, %s333_s20  }
   0xe   : > { %p1860_p5 = por %p344_p2, %p343_p0  ;;  %p1864_p6 = por %p350_p4, %p349_p3 }
   0xf   : > { %2177 = sst [smem:[#allocation5_spill]] %s1858_s22  ;;  %p1323_p7 = scmp.ge.s32.totalorder %s1738_s16, 1 }
  0x10   : > { %p414_p8 = scmp.lt.s32.totalorder %s1738_s16, 3 }
  0x12   : > { %p415_p9 = pnand %p1323_p7, %p414_p8 }
  0x13   : > { %s2180_s1 = sld [smem:[#allocation7_spill]] (!%p415_p9)  ;;  %v1740_v3 = vmov (!%p415_p9), 0.0|0.0   ;;  %vm1741_vm0 = vmmov (!%p415_p9), 0   ;;  %v1742_v6 = vmov (!%p415_p9), 0.0   ;;  %p459_p10 = scmp.lt.s32.totalorder (!%p415_p9), %s1843_s17, 1  ;;  %vm483_vm1 = vcmask (!%p415_p9), 261120  }
  0x14   : > { %418 = sbr.rel (%p415_p9) target bundleno = 2293 (0x8f5), region = 76  ;;  %1513 = vmatprep.subr.bf16.mxu0 (!%p415_p9), %v1740_v3  ;;  %1412 = vmatprep.mubr.msk.f32.mxu0 (!%p415_p9), %vm1741_vm0, %v1742_v6  ;;  %s2181_s3 = sld [smem:[#allocation9_spill]] (!%p415_p9)  ;;  %vm1980_vm2 = vmpackc.low (!%p415_p9), %vm483_vm1, %vm483_vm1  ;;  %vm743_vm3 = vcmask (!%p415_p9), 523264   ;;  %v931_v49 = vld [vmem:[%s2160_s4 + $0x18] sm:$0xff] (!%p415_p9) }
  0x15   : > { %s2171_s18 = smov (!%p415_p9), 32   ;;  %1519 = vmatprep.subr.bf16.mxu1 (!%p415_p9), %v1740_v3  ;;  %1431 = vmatprep.mubr.msk.f32.mxu1 (!%p415_p9), %vm1741_vm0, %v1742_v6  ;;  %s2182_s0 = sld [smem:[#allocation6_spill]] (!%p415_p9) }
  0x16   : > { %s2183_s20 = smov (!%p415_p9), 32   ;;  %s2184_s2 = sld [smem:[#allocation8_spill]] (!%p415_p9) }
  0x19   : > { %v472_v0 = vld [vmem:[%s2180_s1] sm:$0xff] (!%p415_p9)  ;;  %v473_v1 = vld [vmem:[%s2180_s1 + $0x8] sm:$0xff] (!%p415_p9)  ;;  %v474_v2 = vld [vmem:[%s2180_s1 + $0x10] sm:$0xff] (!%p415_p9) }
  0x1a   : > { %v1514_v4 = vpack.c.bf16 (!%p415_p9), %v473_v1, %v472_v0  ;;  %v475_v5 = vld [vmem:[%s2180_s1 + $0x18] sm:$0xff] (!%p415_p9)  ;;  %v1889_v7 = vld [vmem:[%s2181_s3 + $0x10] sm:$0xff] (!%p415_p9)  ;;  %v1894_v8 = vld [vmem:[%s2181_s3] sm:$0xff] (!%p415_p9) }
  0x1b   : > { %569 = vrot.lane.b32.xlu1 %v1889_v7, %s2171_s18  ;;  %565 = vrot.lane.b32.xlu0 %v1894_v8, %s2171_s18  ;;  %v1517_v9 = vpack.c.bf16 %v475_v5, %v474_v2  ;;  %s460_s22 = scalar_select %p459_p10, %s1843_s17, 1  ;;  %v1904_v10 = vld [vmem:[%s2181_s3 + $0x18] sm:$0xff]  ;;  %v1909_v11 = vld [vmem:[%s2181_s3 + $0x8] sm:$0xff] }
  0x1c   : > { %1515 = vmatpush3.bf16.msra.mxu0 %v1514_v4  ;;  %v1536_v13 = vpack.c.bf16 %v1909_v11, %v1894_v8  ;;  %v469_v14 = vld [vmem:[%s2181_s3 + $0x28] sm:$0xff]  ;;  %v468_v15 = vld [vmem:[%s2181_s3 + $0x20] sm:$0xff]  ;;  %v1539_v16 = vpack.c.bf16 %v1904_v10, %v1889_v7  ;;  %v471_v17 = vld [vmem:[%s2181_s3 + $0x38] sm:$0xff]  ;;  %s1350_s18 = sshll.u32 %s1843_s17, 7  ;;  %s1746_s17 = smov [#allocation2]  }
  0x1d   : > { %1516 = vmatprep.subr.bf16.mxu0 %v1740_v3  ;;  %s1325_s27 = sshll.u32 %s460_s22, 3  ;;  %v470_v18 = vld [vmem:[%s2181_s3 + $0x30] sm:$0xff]  ;;  %v1542_v19 = vpack.c.bf16 %v469_v14, %v468_v15  ;;  %v1326_v27 = vld [vmem:[%s2184_s2] ss:$0 sm:$0xff]  ;;  %s1745_s22 = smov 64  }
  0x1e   : > { %s462_s1 = scalar_lea.vmem %s2182_s0, %s1325_s27  ;;  %v1545_v20 = vpack.c.bf16 %v471_v17, %v470_v18  ;;  %s456_s27 = sand.u32 1, %s1730_s30  }
  0x1f   : > { %571 = vrot.lane.b32.xlu1 %v1904_v10, %s2183_s20  ;;  %567 = vrot.lane.b32.xlu0 %v1909_v11, %s2183_s20  ;;  %v1922_v12 = vld [vmem:[%s462_s1] sm:$0xff]  ;;  %s1324_s28 = sshll.u32 %s456_s27, 3  ;;  %s2113_s3 = scalar_lea.hbm %s2170_s14, %s1350_s18 }
  0x20   : > { %1518 = vmatpush3.bf16.msra.mxu0 %v1517_v9  ;;  %s458_s1 = scalar_lea.vmem [#allocation2], %s1324_s28  ;;  %s1248_s21 = scalar_lea.sflag [#allocation3], %s456_s27 }
  0x21   : > { %1535 = vmatprep.subr.bf16.mxu0 %v1740_v3  ;;  %s1261_s0 = sshll.u32 %s458_s1, 4  ;;  %s1680_s28 = sshll.u32 %s1746_s17, 4  ;;  %s2115_s0 = int_to_ptr.vmem [resolvable:$true] %s1261_s0  ;;  %s1681_s28 = int_to_ptr.vmem [resolvable:$false] %s1680_s28 }
  0x22   : > { %s1676_s25 = scalar_lea.vmem %s2115_s0, 128  ;;  %p1683_p0 = scmp.lt.s32.totalorder %s2115_s0, %s1681_s28 }
  0x23   : > { %1413 = vmatmul.mubr.msk.f32.vlgmr.msra.gmra.mrb[0].mxu0 %vm483_vm1, %v1922_v12  ;;  %575 = vrot.lane.b32.xlu1 %v469_v14, %s2183_s20  ;;  %p1677_p11 = scmp.ne.s32.totalorder %s2115_s0, %s1676_s25 }
  0x24   : > { %573 = vrot.lane.b32.xlu0 %v468_v15, %s2183_s20  ;;  %1537 = vmatpush3.bf16.msra.mxu0 %v1536_v13 }
  0x25   : > { %1538 = vmatprep.subr.bf16.mxu0 %v1740_v3  ;;  %1450 = vmatprep.mubr.msk.f32.mxu0 %vm1741_vm0, %v1742_v6  ;;  %p1678_p12 = pnand %p1677_p11, %p1860_p5 }
  0x27   : > { %579 = vrot.lane.b32.xlu1 %v471_v17, %s2183_s20  ;;  %p1679_p13 = pneg %p1678_p12 }
  0x28   : > { %577 = vrot.lane.b32.xlu0 %v470_v18, %s2183_s20  ;;  %1540 = vmatpush3.bf16.msra.mxu0 %v1539_v16  ;;  %s1744_s20 = smov 96  }
  0x29   : > { %1541 = vmatprep.subr.bf16.mxu0 %v1740_v3 }
  0x2c   : > { %1543 = vmatpush3.bf16.msra.mxu0 %v1542_v19 }
  0x2d   : > { %1544 = vmatprep.subr.bf16.mxu0 %v1740_v3 }
  0x30   : > { %1546 = vmatpush3.bf16.msra.mxu0 %v1545_v20 }
  0x31   : > { %1547 = vmatprep.subr.bf16.mxu0 %v1740_v3 }
  0x8d   : > { %v570_v21 = vpop.permute.xlu1 %569  ;;  %v566_v22 = vpop.permute.xlu0 %565 }
  0x91   : > { %v572_v23 = vpop.permute.xlu1 %571  ;;  %v568_v24 = vpop.permute.xlu0 %567 }
  0x95   : > { %v576_v25 = vpop.permute.xlu1 %575 }
  0x96   : > { %v574_v26 = vpop.permute.xlu0 %573 }
  0x99   : > { %v580_v31 = vpop.permute.xlu1 %579 }
  0x9a   : > { %v578_v32 = vpop.permute.xlu0 %577 }
  0xf6   : > { %v553_v28 = vpop.f32.mrb[0].mxu0 }
  0xf7   : > { %v1956_v29 = vadd.f32 %v1326_v27, %v553_v28  ;;  %v1414_v30 = vpop.f32.mrb[1].mxu0 }
  0xf9   : > { %v591_v33 = vmul.f32 %v570_v21, %v1956_v29  ;;  %v592_v34 = vmul.f32 %v572_v23, %v1956_v29  ;;  %v589_v35 = vmul.f32 %v566_v22, %v1956_v29  ;;  %v590_v36 = vmul.f32 %v568_v24, %v1956_v29 }
  0xfa   : > { %v596_v37 = vmul.f32 %v580_v31, %v1956_v29  ;;  %v595_v38 = vmul.f32 %v578_v32, %v1956_v29  ;;  %v593_v41 = vmul.f32 %v574_v26, %v1956_v29  ;;  %v594_v42 = vmul.f32 %v576_v25, %v1956_v29 }
  0xfb   : > { %v1633_v39 = vpack.i.bf16 %v592_v34, %v591_v33  ;;  %v1628_v40 = vpack.i.bf16 %v590_v36, %v589_v35 }
  0xfc   : > { %v1643_v43 = vpack.i.bf16 %v596_v37, %v595_v38  ;;  %v1638_v44 = vpack.i.bf16 %v594_v42, %v593_v41 }
  0xfd   : > { %1634 = vrot.lane.b32.xlu1 %v1633_v39, %s1744_s20  ;;  %1629 = vrot.lane.b32.xlu0 %v1628_v40, %s1744_s20 }
 0x101   : > { %1644 = vrot.lane.b32.xlu1 %v1643_v43, %s1744_s20  ;;  %1639 = vrot.lane.b32.xlu0 %v1638_v44, %s1744_s20  ;;  %s1682_s20 = scalar_lea.vmem %s1681_s28, 256 }
 0x102   : > { %p1684_p1 = scmp.lt.s32.totalorder %s1682_s20, %s1676_s25 }
 0x104   : > { %p1685_p2 = por %p1684_p1, %p1683_p0 }
 0x105   : > { %599 = vrot.lane.b32.xlu1 %v1909_v11, %s1745_s22  ;;  %597 = vrot.lane.b32.xlu0 %v1894_v8, %s1745_s22 }
 0x106   : > { %p1686_p3 = pnand %p1685_p2, %p1679_p13 }
 0x109   : > { %603 = vrot.lane.b32.xlu1 %v1904_v10, %s1745_s22  ;;  %601 = vrot.lane.b32.xlu0 %v1889_v7, %s1745_s22 }
 0x10d   : > { %607 = vrot.lane.b32.xlu1 %v469_v14, %s1745_s22  ;;  %605 = vrot.lane.b32.xlu0 %v468_v15, %s1745_s22 }
 0x111   : > { %611 = vrot.lane.b32.xlu1 %v471_v17, %s1745_s22  ;;  %609 = vrot.lane.b32.xlu0 %v470_v18, %s1745_s22 }
 0x16f   : > { %v1635_v45 = vpop.permute.xlu1 %1634  ;;  %v1630_v46 = vpop.permute.xlu0 %1629 }
 0x170   : > { %v1632_v47 = vunpack.i.h.bf16 %v1630_v46  ;;  %v1631_v48 = vunpack.i.l.bf16 %v1630_v46  ;;  %v1637_v53 = vunpack.i.h.bf16 %v1635_v45  ;;  %v1636_v54 = vunpack.i.l.bf16 %v1635_v45  ;;  %v928_v45 = vld [vmem:[%s2160_s4] sm:$0xff]  ;;  %v929_v46 = vld [vmem:[%s2160_s4 + $0x8] sm:$0xff] }
 0x172   : > { %v1520_v50 = vpack.c.bf16 %v1632_v47, %v1631_v48  ;;  %v1524_v59 = vpack.c.bf16 %v1637_v53, %v1636_v54  ;;  %v1560_v47 = vpack.c.bf16 %v929_v46, %v928_v45  ;;  %v930_v48 = vld [vmem:[%s2160_s4 + $0x10] sm:$0xff] }
 0x173   : > { %v1645_v51 = vpop.permute.xlu1 %1644  ;;  %v1640_v52 = vpop.permute.xlu0 %1639 }
 0x174   : > { %1522 = vmatpush3.bf16.xpose.msk.msra.mxu1 %vm1980_vm2, %v1520_v50  ;;  %v1642_v1 = vunpack.i.h.bf16 %v1640_v52  ;;  %v1641_v2 = vunpack.i.l.bf16 %v1640_v52  ;;  %v1647_v17 = vunpack.i.h.bf16 %v1645_v51  ;;  %v1646_v18 = vunpack.i.l.bf16 %v1645_v51 }
 0x175   : > { %1523 = vmatprep.subr.bf16.mxu1 %v1740_v3  ;;  %v1563_v50 = vpack.c.bf16 %v931_v49, %v930_v48 }
 0x176   : > { %v1528_v10 = vpack.c.bf16 %v1642_v1, %v1641_v2  ;;  %v1532_v20 = vpack.c.bf16 %v1647_v17, %v1646_v18  ;;  %v1132_v18 = vld [vmem:[%s2166_s10 + $0x20] sm:$0xff] }
 0x177   : > { %v600_v55 = vpop.permute.xlu1 %599  ;;  %v598_v57 = vpop.permute.xlu0 %597 }
 0x178   : > { %v622_v56 = vmul.f32 %v600_v55, %v1956_v29  ;;  %v621_v58 = vmul.f32 %v598_v57, %v1956_v29 }
 0x17a   : > { %v1648_v60 = vpack.i.bf16 %v622_v56, %v621_v58  ;;  %v1339_v58 = vld [vmem:[%s2161_s5] ss:$0 sm:$0xff] }
 0x17b   : > { %v604_v61 = vpop.permute.xlu1 %603  ;;  %v602_v63 = vpop.permute.xlu0 %601 }
 0x17c   : > { %v624_v62 = vmul.f32 %v604_v61, %v1956_v29  ;;  %v623_v0 = vmul.f32 %v602_v63, %v1956_v29  ;;  %1649 = vrot.lane.b32.xlu1 %v1648_v60, %s1745_s22  ;;  %1526 = vmatpush3.bf16.xpose.msk.msra.mxu1 %vm1980_vm2, %v1524_v59 }
 0x17d   : > { %1527 = vmatprep.subr.bf16.mxu1 %v1740_v3 }
 0x17e   : > { %v1653_v4 = vpack.i.bf16 %v624_v62, %v623_v0 }
 0x17f   : > { %v608_v5 = vpop.permute.xlu1 %607  ;;  %v606_v8 = vpop.permute.xlu0 %605 }
 0x180   : > { %v626_v7 = vmul.f32 %v608_v5, %v1956_v29  ;;  %v625_v9 = vmul.f32 %v606_v8, %v1956_v29  ;;  %1654 = vrot.lane.b32.xlu1 %v1653_v4, %s1745_s22 }
 0x182   : > { %v1658_v11 = vpack.i.bf16 %v626_v7, %v625_v9  ;;  %v1044_v7 = vld [vmem:[%s2164_s8 + $0x8] sm:$0xff]  ;;  %v1046_v9 = vld [vmem:[%s2164_s8 + $0x18] sm:$0xff] }
 0x183   : > { %v612_v13 = vpop.permute.xlu1 %611  ;;  %v610_v15 = vpop.permute.xlu0 %609 }
 0x184   : > { %v628_v14 = vmul.f32 %v612_v13, %v1956_v29  ;;  %v627_v16 = vmul.f32 %v610_v15, %v1956_v29  ;;  %1659 = vrot.lane.b32.xlu1 %v1658_v11, %s1745_s22  ;;  %1530 = vmatpush3.bf16.xpose.msk.msra.mxu1 %vm1980_vm2, %v1528_v10  ;;  %v1128_v11 = vld [vmem:[%s2166_s10] sm:$0xff]  ;;  %v1129_v13 = vld [vmem:[%s2166_s10 + $0x8] sm:$0xff] }
 0x185   : > { %1531 = vmatprep.subr.bf16.mxu1 %v1740_v3  ;;  %v1572_v15 = vpack.c.bf16 %v1129_v13, %v1128_v11 }
 0x186   : > { %v1663_v19 = vpack.i.bf16 %v628_v14, %v627_v16  ;;  %v1130_v14 = vld [vmem:[%s2166_s10 + $0x10] sm:$0xff]  ;;  %v1131_v16 = vld [vmem:[%s2166_s10 + $0x18] sm:$0xff] }
 0x187   : > { %v1575_v17 = vpack.c.bf16 %v1131_v16, %v1130_v14 }
 0x188   : > { %1664 = vrot.lane.b32.xlu1 %v1663_v19, %s1745_s22  ;;  %v1133_v19 = vld [vmem:[%s2166_s10 + $0x28] sm:$0xff] }
 0x18c   : > { %1534 = vmatpush3.bf16.xpose.msk.msra.mxu1 %vm1980_vm2, %v1532_v20  ;;  %v1578_v20 = vpack.c.bf16 %v1133_v19, %v1132_v18 }
 0x18d   : > { %1559 = vmatprep.subr.bf16.mxu1 %v1740_v3 }
 0x193   : > { %1432 = vmatmul.mubr.msk.f32.vlgmr.msra.gmra.mrb[0].mxu1 %vm483_vm1, %v1956_v29 }
 0x194   : > { %1480 = vmatprep.mubr.msk.f32.mxu1 %vm1741_vm0, %v1742_v6  ;;  %1561 = vmatpush3.bf16.msra.mxu1 %v1560_v47 }
 0x195   : > { %1562 = vmatprep.subr.bf16.mxu1 %v1740_v3 }
 0x198   : > { %1564 = vmatpush3.bf16.msra.mxu1 %v1563_v50 }
 0x199   : > { %1571 = vmatprep.subr.bf16.mxu1 %v1740_v3 }
 0x1ee   : > { %v1650_v27 = vpop.permute.xlu1 %1649 }
 0x1ef   : > { %v1652_v31 = vunpack.i.h.bf16 %v1650_v27  ;;  %v1651_v32 = vunpack.i.l.bf16 %v1650_v27  ;;  %v1342_v27 = vld [vmem:[%s2163_s7] ss:$0 sm:$0xff] }
 0x1f1   : > { %v1548_v34 = vpack.c.bf16 %v1652_v31, %v1651_v32  ;;  %v1135_v31 = vld [vmem:[%s2166_s10 + $0x38] sm:$0xff] }
 0x1f2   : > { %v1655_v30 = vpop.permute.xlu1 %1654 }
 0x1f3   : > { %v1657_v35 = vunpack.i.h.bf16 %v1655_v30  ;;  %v1656_v36 = vunpack.i.l.bf16 %v1655_v30 }
 0x1f5   : > { %v1551_v37 = vpack.c.bf16 %v1657_v35, %v1656_v36 }
 0x1f6   : > { %v1660_v33 = vpop.permute.xlu1 %1659 }
 0x1f7   : > { %v1662_v38 = vunpack.i.h.bf16 %v1660_v33  ;;  %v1661_v39 = vunpack.i.l.bf16 %v1660_v33  ;;  %v1343_v33 = vld [vmem:[%s2165_s9] ss:$0 sm:$0xff] }
 0x1f9   : > { %v1554_v41 = vpack.c.bf16 %v1662_v38, %v1661_v39 }
 0x1fa   : > { %v1665_v40 = vpop.permute.xlu1 %1664 }
 0x1fb   : > { %v1667_v42 = vunpack.i.h.bf16 %v1665_v40  ;;  %v1666_v43 = vunpack.i.l.bf16 %v1665_v40 }
 0x1fd   : > { %v1557_v44 = vpack.c.bf16 %v1667_v42, %v1666_v43 }
 0x266   : > { %v738_v21 = vpop.f32.mrb[0].mxu1 }
 0x267   : > { %v742_v22 = vmul.f32 0.5, %v738_v21  ;;  %v1433_v23 = vpop.f32.mrb[1].mxu1 }
 0x269   : > { %v744_v24 = vsel %vm743_vm3, %v742_v22, -inf }
 0x26a   : > { %745 = vmax.xlane.f32.xlu0 %v744_v24 }
 0x2f7   : > { %v746_v25 = vpop.xlane.xlu0 %745 }
 0x2f8   : > { %v747_v26 = vsub.f32 %v742_v22, %v746_v25  ;;  %v1341_v25 = vld [vmem:[%s2162_s6] ss:$0 sm:$0xff] }
 0x2fa   : > { %v748_v28 = vmul.f32 1.442695, %v747_v26 }
 0x2fc   : > { %1668 = vpow2.f32 %v748_v28 }
 0x306   : > { %v1669_v29 = vpop.eup %1668 }
 0x307   : > { %1451 = vmatmul.mubr.msk.f32.vlgmr.msra.gmra.mrb[2].mxu0 %vm743_vm3, %v1669_v29 }
 0x308   : > { %1549 = vmatpush3.bf16.msra.mxu0 %v1548_v34  ;;  %1469 = vmatprep.mubr.msk.f32.mxu0 %vm1741_vm0, %v1742_v6 }
 0x309   : > { %1550 = vmatprep.subr.bf16.mxu0 %v1740_v3 }
 0x30c   : > { %1552 = vmatpush3.bf16.msra.mxu0 %v1551_v37  ;;  %v1345_v37 = vld [vmem:[%s2167_s11] ss:$0 sm:$0xff] }
 0x30d   : > { %1553 = vmatprep.subr.bf16.mxu0 %v1740_v3 }
 0x310   : > { %1555 = vmatpush3.bf16.msra.mxu0 %v1554_v41 }
 0x311   : > { %1556 = vmatprep.subr.bf16.mxu0 %v1740_v3 }
 0x314   : > { %1558 = vmatpush3.bf16.msra.mxu0 %v1557_v44 }
 0x315   : > { %1565 = vmatprep.subr.bf16.mxu0 %v1740_v3 }
 0x317   : > { %1470 = vmatmul.mubr.msk.f32.vlgmr.msra.gmra.mrb[4].mxu0 %vm743_vm3, %v1669_v29 }
 0x318   : > { %1491 = vmatprep.mubr.msk.f32.mxu0 %vm1741_vm0, %v1742_v6 }
 0x3da   : > { %v819_v51 = vpop.f32.mrb[2].mxu0 }
 0x3db   : > { %v1452_v52 = vpop.f32.mrb[3].mxu0  ;;  %v925_v53 = vmax.f32 %v819_v51, 1e-30 }
 0x3dc   : > { %v1347_v52 = vld [vmem:[%s2168_s12] ss:$0 sm:$0xff] }
 0x3dd   : > { %1670 = vrcp.f32 %v925_v53 }
 0x3e7   : > { %v1671_v54 = vpop.eup %1670 }
 0x3ea   : > { %v921_v55 = vpop.f32.mrb[4].mxu0 }
 0x3eb   : > { %v927_v56 = vmul.f32 %v1671_v54, %v921_v55  ;;  %v1471_v57 = vpop.f32.mrb[5].mxu0  ;;  %v1348_v54 = vld [vmem:[%s2169_s13] ss:$0 sm:$0xff] }
 0x3ed   : > { %1481 = vmatmul.mubr.msk.f32.vlgmr.msra.gmra.mrb[2].mxu1 %vm483_vm1, %v927_v56 }
 0x3ee   : > { %1510 = vmatprep.mubr.msk.f32.mxu1 %vm1741_vm0, %v1742_v6  ;;  %v1043_v6 = vld [vmem:[%s2164_s8] sm:$0xff]  ;;  %1573 = vmatpush3.bf16.msra.mxu1 %v1572_v15 }
 0x3ef   : > { %v1566_v8 = vpack.c.bf16 %v1044_v7, %v1043_v6  ;;  %1574 = vmatprep.subr.bf16.mxu1 %v1740_v3 }
 0x3f1   : > { %1567 = vmatpush3.bf16.msra.mxu0 %v1566_v8 }
 0x3f2   : > { %1568 = vmatprep.subr.bf16.mxu0 %v1740_v3  ;;  %1576 = vmatpush3.bf16.msra.mxu1 %v1575_v17 }
 0x3f3   : > { %1577 = vmatprep.subr.bf16.mxu1 %v1740_v3 }
 0x3f6   : > { %1579 = vmatpush3.bf16.msra.mxu1 %v1578_v20 }
 0x3f7   : > { %1580 = vmatprep.subr.bf16.mxu1 %v1740_v3  ;;  %v1134_v3 = vld [vmem:[%s2166_s10 + $0x30] sm:$0xff] }
 0x3f8   : > { %v1581_v32 = vpack.c.bf16 %v1135_v31, %v1134_v3 }
 0x3fa   : > { %1582 = vmatpush3.bf16.msra.mxu1 %v1581_v32 }
 0x4c0   : > { %v1008_v59 = vpop.f32.mrb[2].mxu1 }
 0x4c1   : > { %v1009_v60 = vadd.f32 %v1339_v58, %v1008_v59  ;;  %v1482_v61 = vpop.f32.mrb[3].mxu1 }
 0x4c3   : > { %v1012_v62 = vadd.f32 %v1009_v60, %v1922_v12  ;;  %v1045_v12 = vld [vmem:[%s2164_s8 + $0x10] sm:$0xff] }
 0x4c4   : > { %v1569_v10 = vpack.c.bf16 %v1046_v9, %v1045_v12 }
 0x4c5   : > { %v1015_v63 = vsel %vm483_vm1, %v1012_v62, 0.0 }
 0x4c6   : > { %1016 = vadd.xlane.f32.xlu1 %v1015_v63  ;;  %1570 = vmatpush3.bf16.msra.mxu0 %v1569_v10 }
 0x553   : > { %v1017_v0 = vpop.xlane.xlu1 %1016 }
 0x554   : > { %v1019_v1 = vmul.f32 0.03125, %v1017_v0 }
 0x556   : > { %v1020_v2 = vsub.f32 %v1012_v62, %v1019_v1 }
 0x558   : > { %v1021_v4 = vmul.f32 %v1020_v2, %v1020_v2 }
 0x55a   : > { %v1022_v5 = vsel %vm483_vm1, %v1021_v4, 0.0 }
 0x55b   : > { %1023 = vadd.xlane.f32.xlu0 %v1022_v5 }
 0x5e8   : > { %v1024_v21 = vpop.xlane.xlu0 %1023 }
 0x5e9   : > { %v1025_v22 = vmul.f32 0.03125, %v1024_v21 }
 0x5eb   : > { %v1026_v23 = vadd.f32 1e-05, %v1025_v22 }
 0x5ed   : > { %1672 = vrsqrt.f32 %v1026_v23 }
 0x5f7   : > { %v1673_v24 = vpop.eup %1672 }
 0x5f8   : > { %v1028_v26 = vmul.f32 %v1673_v24, %v1020_v2 }
 0x5fa   : > { %v1035_v28 = vmul.f32 %v1341_v25, %v1028_v26 }
 0x5fc   : > { %v1042_v30 = vadd.f32 %v1342_v27, %v1035_v28 }
 0x5fe   : > { %1492 = vmatmul.mubr.msk.f32.vlgmr.msra.gmra.mrb[6].mxu0 %vm483_vm1, %v1042_v30 }
 0x6d1   : > { %v1123_v29 = vpop.f32.mrb[6].mxu0 }
 0x6d2   : > { %v1124_v34 = vadd.f32 %v1343_v33, %v1123_v29  ;;  %v1493_v35 = vpop.f32.mrb[7].mxu0 }
 0x6d4   : > { %v1127_v36 = vmax.f32 %v1124_v34, 0.0 }
 0x6d6   : > { %1511 = vmatmul.mubr.msk.f32.vlgmr.msra.gmra.mrb[4].mxu1 %vm743_vm3, %v1127_v36 }
 0x7a9   : > { %v1212_v38 = vpop.f32.mrb[4].mxu1 }
 0x7aa   : > { %v1213_v39 = vadd.f32 %v1345_v37, %v1212_v38  ;;  %v1512_v40 = vpop.f32.mrb[5].mxu1 }
 0x7ac   : > { %v1216_v41 = vadd.f32 %v1213_v39, %v1042_v30 }
 0x7ae   : > { %v1219_v42 = vsel %vm483_vm1, %v1216_v41, 0.0 }
 0x7af   : > { %1220 = vadd.xlane.f32.xlu0 %v1219_v42 }
 0x83c   : > { %v1221_v43 = vpop.xlane.xlu0 %1220 }
 0x83d   : > { %v1222_v44 = vmul.f32 0.03125, %v1221_v43 }
 0x83f   : > { %v1223_v45 = vsub.f32 %v1216_v41, %v1222_v44 }
 0x841   : > { %v1224_v46 = vmul.f32 %v1223_v45, %v1223_v45 }
 0x843   : > { %v1225_v47 = vsel %vm483_vm1, %v1224_v46, 0.0 }
 0x844   : > { %1226 = vadd.xlane.f32.xlu0 %v1225_v47 }
 0x8d1   : > { %v1227_v48 = vpop.xlane.xlu0 %1226 }
 0x8d2   : > { %v1228_v49 = vmul.f32 0.03125, %v1227_v48 }
 0x8d4   : > { %v1229_v50 = vadd.f32 1e-05, %v1228_v49 }
 0x8d6   : > { %1674 = vrsqrt.f32 %v1229_v50 }
 0x8e0   : > { %v1675_v51 = vpop.eup %1674 }
 0x8e1   : > { %v1231_v53 = vmul.f32 %v1675_v51, %v1223_v45 }
 0x8e3   : > { %v1238_v55 = vmul.f32 %v1347_v52, %v1231_v53 }
 0x8e5   : > { %v1245_v56 = vadd.f32 %v1348_v54, %v1238_v55 }
 0x8e7   : > { %1246 = vst.msk [vmem:[%s458_s1] sm:$0xff] %vm483_vm1, %v1245_v56 }
 0x8e8   : > { %1689 = shalt.err (!%p1686_p3)
}
 0x8e9   : > { %s1690_s2 = scalar_lea.hbm %s2113_s3, 128  ;;  %s1694_s18 = scalar_lea.hbm %s2170_s14, 256 }
 0x8ea   : > { %p1691_p4 = scmp.ne.s32.totalorder %s2113_s3, %s1690_s2  ;;  %p1695_p9 = scmp.lt.u32.totalorder %s2113_s3, %s2170_s14 }
 0x8eb   : > { %p1696_p10 = scmp.lt.u32.totalorder %s1694_s18, %s1690_s2  ;;  %p1698_p12 = scmp.lt.u32.totalorder %s1690_s2, %s2113_s3 }
 0x8ec   : > { %p1692_p7 = pnand %p1691_p4, %p1860_p5 }
 0x8ed   : > { %p1697_p11 = por %p1696_p10, %p1695_p9 }
 0x8ee   : > { %p1693_p8 = pneg %p1692_p7 }
 0x8ef   : > { %p1699_p13 = por %p1698_p12, %p1697_p11 }
 0x8f1   : > { %p1700_p0 = pnand %p1699_p13, %p1693_p8 }
 0x8f3   : > { %1703 = shalt.err (!%p1700_p0)
}
 0x8f4   : > { %1583 = dma.vmem_to_hbm [thread:$0]  (%p1860_p5), %s2115_s0, 128, %s2113_s3, %s1248_s21  }
 0x8f5 PF: > { %p1589_p1 = scmp.ge.s32.totalorder %s1738_s16, 2  ;;  %s1273_s25 = sand.u32 1, %s1726_s29  }
 0x8f6   : > { %s1274_s17 = scalar_lea.sflag [#allocation3], %s1273_s25 }
 0x8f7   : > { %p1586_p2 = pnand %p1589_p1, %p1864_p6 }
 0x8f9   : > { %1721 = dma.done.wait (!%p1586_p2), %s1274_s17, 128  }
 0x8fa   : > { %1723 = vsyncadd (!%p1586_p2), %s1274_s17, 4294967168  ;;  %s2187_s28 = sld [smem:[#allocation5_spill]]  ;;  %p24_p3 = scmp.ge.s32.totalorder %s1847_s19, 4  }
 0x8fb   : > { %s2188_s29 = smov %s1730_s30  ;;  %s2189_s30 = smov %s1734_s15 }
 0x8fc   : > { %s2191_s16 = smov %s1847_s19  ;;  %26 = sbr.rel (!%p24_p3) target bundleno = 8 (0x8), region = 111 }
 0x900   : > { %s2190_s15 = smov %s2187_s28 }
 0x903   :  { %1279 = vsyncpa [#allocation3], 1 }
 0x904   :  { %1281 = vsyncpa [#allocation3 + $0x1], 1 }

</bundles_post_ra>
